<compile_context>
chip_gen: v7x
topology: tpu7x:2x2x1
jax: 0.10.0
libtpu: 0.0.40
codegen_flags: <defaults>
</compile_context>

<pallas_src>
import functools

import jax
import jax.numpy as jnp
from jax import lax
from jax.experimental import pallas as pl
from jax.experimental.pallas import tpu as pltpu


def _addnorm_kernel(seed_ref, x_ref, y_ref, g_ref, b_ref, o_ref,
                    *, dropout_p, training, eps):
    """One grid step processes a (block_rows, D) tile of rows."""
    x = x_ref[...].astype(jnp.float32)
    y = y_ref[...].astype(jnp.float32)

    if training and dropout_p > 0.0:
        rows, cols = y_ref.shape
        # Global element index (unique per element of this call).
        row_ids = lax.broadcasted_iota(jnp.int32, (rows, cols), 0)
        col_ids = lax.broadcasted_iota(jnp.int32, (rows, cols), 1)
        gidx = (pl.program_id(0) * rows + row_ids) * cols + col_ids
        # Counter-based hash PRNG: mix index with seed, murmur3 fmix32.
        h = gidx.astype(jnp.uint32) + (
            seed_ref[0].astype(jnp.uint32) * jnp.uint32(0x9E3779B9))
        h = h ^ (h >> jnp.uint32(16))
        h = h * jnp.uint32(0x85EBCA6B)
        h = h ^ (h >> jnp.uint32(13))
        h = h * jnp.uint32(0xC2B2AE35)
        h = h ^ (h >> jnp.uint32(16))
        # Top 24 bits -> uniform [0, 1).  Inverted dropout on Y.
        u = (h >> jnp.uint32(8)).astype(jnp.int32).astype(jnp.float32) * (
            1.0 / 16777216.0)
        keep = u >= jnp.float32(dropout_p)
        y = jnp.where(keep, y * (1.0 / (1.0 - dropout_p)), 0.0)

    z = x + y                                              # residual add
    mean = jnp.mean(z, axis=-1, keepdims=True)             # LayerNorm (1 pass)
    mean_sq = jnp.mean(z * z, axis=-1, keepdims=True)
    var = jnp.maximum(mean_sq - mean * mean, 0.0)
    z_hat = (z - mean) * lax.rsqrt(var + eps)
    out = z_hat * g_ref[...].astype(jnp.float32) + b_ref[...].astype(jnp.float32)
    o_ref[...] = out.astype(o_ref.dtype)


def add_norm(x, y, gamma, beta, *, dropout_p=0.0, training=False,
             seed=0, eps=1e-5, block_rows=None):
    """Pallas AddNorm: LayerNorm(Dropout(Y) + X), normalized over last dim."""
    assert x.shape == y.shape
    orig_shape = x.shape
    d = orig_shape[-1]
    x2 = x.reshape(-1, d)
    y2 = y.reshape(-1, d)
    n = x2.shape[0]
    itemsize = jnp.dtype(x2.dtype).itemsize

    # --- tile sizing: mem-bound kernel -> big row tiles (~4 MiB per stream) ---
    if block_rows is None:
        target_rows = (4 << 20) // max(1, d * itemsize)
        block_rows = int(max(8, min(1024, target_rows)))
    if block_rows >= n:
        block_rows = n                               # one full tile, any n legal
    else:
        block_rows = max(8, (block_rows // 8) * 8)   # sublane (8) alignment
    grid = pl.cdiv(n, block_rows)                    # partial last tile is masked

    # --- VMEM budget: double-buffered X/Y/O tiles + f32 working set + slack ---
    tile_bytes = block_rows * d * itemsize
    vmem_limit = int(min(max(2 * 3 * tile_bytes + 4 * block_rows * d * 4
                             + (4 << 20), 32 << 20), 64 << 20))

    g2 = gamma.reshape(1, d)
    b2 = beta.reshape(1, d)
    seed_arr = jnp.asarray([seed], dtype=jnp.int32)

    kernel = functools.partial(
        _addnorm_kernel, dropout_p=float(dropout_p),
        training=bool(training), eps=float(eps))

    grid_spec = pltpu.PrefetchScalarGridSpec(
        num_scalar_prefetch=1,                 # seed -> SMEM
        grid=(grid,),
        in_specs=[
            pl.BlockSpec((block_rows, d), lambda i, s: (i, 0)),   # X tile
            pl.BlockSpec((block_rows, d), lambda i, s: (i, 0)),   # Y tile
            pl.BlockSpec((1, d), lambda i, s: (0, 0)),            # gamma
            pl.BlockSpec((1, d), lambda i, s: (0, 0)),            # beta
        ],
        out_specs=pl.BlockSpec((block_rows, d), lambda i, s: (i, 0)),
    )

    cost = pl.CostEstimate(
        flops=10 * n * d,
        transcendentals=n,                      # one rsqrt per row
        bytes_accessed=3 * n * d * itemsize + 2 * d * 4)

    out2 = pl.pallas_call(
        kernel,
        out_shape=jax.ShapeDtypeStruct((n, d), x.dtype),
        grid_spec=grid_spec,
        compiler_params=pltpu.CompilerParams(
            dimension_semantics=("parallel",),  # per-element PRNG -> order-free
            vmem_limit_bytes=vmem_limit),
        cost_estimate=cost,
    )(seed_arr, x2, y2, g2, b2)

    return out2.reshape(orig_shape)


def _reference_eval(x, y, gamma, beta, eps=1e-5):
    z = (y + x).astype(jnp.float32)
    mean = jnp.mean(z, axis=-1, keepdims=True)
    var = jnp.mean((z - mean) ** 2, axis=-1, keepdims=True)
    z_hat = (z - mean) * lax.rsqrt(var + eps)
    return (z_hat * gamma + beta).astype(x.dtype)


if __name__ == "__main__":
    batch, seq, hidden = 2, 8, 32
    dropout_p = 0.1

    key = jax.random.PRNGKey(0)
    kx, ky = jax.random.split(key)
    x = jax.random.normal(kx, (batch, seq, hidden), dtype=jnp.float32)
    y = jax.random.normal(ky, (batch, seq, hidden), dtype=jnp.float32)

    # Deterministic LayerNorm parameters (nn.LayerNorm default is ones/zeros;
    # perturb slightly so the affine part is actually exercised).
    gamma = 1.0 + 0.01 * jnp.arange(hidden, dtype=jnp.float32)
    beta = 0.001 * jnp.arange(hidden, dtype=jnp.float32)

    # Eval mode (dropout = identity): exact, checkable semantics.
    out = add_norm(x, y, gamma, beta, dropout_p=dropout_p, training=False)
    out = jax.block_until_ready(out)

    ref = _reference_eval(x, y, gamma, beta)
    assert out.shape == x.shape and out.dtype == x.dtype
    assert jnp.max(jnp.abs(out - ref)) < 5e-5, "mismatch vs reference"

    # Training mode (in-kernel hash-PRNG dropout) — smoke test only, since the
    # mask stream cannot match torch's RNG bit-for-bit.
    out_train = jax.block_until_ready(
        add_norm(x, y, gamma, beta, dropout_p=dropout_p, training=True, seed=42))
    assert out_train.shape == x.shape
    assert bool(jnp.all(jnp.isfinite(out_train)))

    print("KERNEL_OK")
</pallas_src>

<mosaic_0001>
module attributes {stable_mosaic.version = 11 : i64} {
  func.func @_addnorm_kernel(%arg0: i32, %arg1: memref<1xi32, #tpu.memory_space<smem>>, %arg2: memref<16x32xf32, #tpu.memory_space<vmem>>, %arg3: memref<16x32xf32, #tpu.memory_space<vmem>>, %arg4: memref<1x32xf32, #tpu.memory_space<vmem>>, %arg5: memref<1x32xf32, #tpu.memory_space<vmem>>, %arg6: memref<16x32xf32, #tpu.memory_space<vmem>>) attributes {dimension_semantics = [#tpu.dimension_semantics<parallel>], iteration_bounds = array<i64: 1>, scalar_prefetch = 1 : i64, scratch_operands = 0 : i64, tpu.core_type = #tpu.core_type<tc>, window_params = [{transform_indices = @transform_0, window_bounds = array<i64: 16, 32>}, {transform_indices = @transform_1, window_bounds = array<i64: 16, 32>}, {pipeline_mode = #tpu.pipeline_mode<synchronous>, transform_indices = @transform_2, window_bounds = array<i64: 1, 32>}, {pipeline_mode = #tpu.pipeline_mode<synchronous>, transform_indices = @transform_3, window_bounds = array<i64: 1, 32>}, {transform_indices = @transform_4, window_bounds = array<i64: 16, 32>}]} {
    %c0 = arith.constant 0 : index
    %c0_0 = arith.constant 0 : index
    %0 = vector.load %arg2[%c0, %c0_0] : memref<16x32xf32, #tpu.memory_space<vmem>>, vector<16x32xf32>
    %c0_1 = arith.constant 0 : index
    %c0_2 = arith.constant 0 : index
    %1 = vector.load %arg3[%c0_1, %c0_2] : memref<16x32xf32, #tpu.memory_space<vmem>>, vector<16x32xf32>
    %2 = arith.addf %0, %1 : vector<16x32xf32>
    %cst = arith.constant dense<0.000000e+00> : vector<16xf32>
    %3 = vector.multi_reduction <add>, %2, %cst [1] : vector<16x32xf32> to vector<16xf32>
    %4 = vector.shape_cast %3 : vector<16xf32> to vector<16x1xf32>
    %cst_3 = arith.constant 3.200000e+01 : f32
    %5 = vector.broadcast %cst_3 : f32 to vector<16x1xf32>
    %6 = arith.divf %4, %5 : vector<16x1xf32>
    %7 = arith.mulf %2, %2 : vector<16x32xf32>
    %cst_4 = arith.constant dense<0.000000e+00> : vector<16xf32>
    %8 = vector.multi_reduction <add>, %7, %cst_4 [1] : vector<16x32xf32> to vector<16xf32>
    %9 = vector.shape_cast %8 : vector<16xf32> to vector<16x1xf32>
    %cst_5 = arith.constant 3.200000e+01 : f32
    %10 = vector.broadcast %cst_5 : f32 to vector<16x1xf32>
    %11 = arith.divf %9, %10 : vector<16x1xf32>
    %12 = arith.mulf %6, %6 : vector<16x1xf32>
    %13 = arith.subf %11, %12 : vector<16x1xf32>
    %cst_6 = arith.constant 0.000000e+00 : f32
    %14 = vector.broadcast %cst_6 : f32 to vector<16x1xf32>
    %15 = arith.maximumf %13, %14 : vector<16x1xf32>
    %16 = vector.broadcast %6 : vector<16x1xf32> to vector<16x32xf32>
    %17 = arith.subf %2, %16 : vector<16x32xf32>
    %cst_7 = arith.constant 9.99999974E-6 : f32
    %18 = vector.broadcast %cst_7 : f32 to vector<16x1xf32>
    %19 = arith.addf %15, %18 : vector<16x1xf32>
    %20 = math.rsqrt %19 : vector<16x1xf32>
    %21 = vector.broadcast %20 : vector<16x1xf32> to vector<16x32xf32>
    %22 = arith.mulf %17, %21 : vector<16x32xf32>
    %c0_8 = arith.constant 0 : index
    %c0_9 = arith.constant 0 : index
    %23 = vector.load %arg4[%c0_8, %c0_9] : memref<1x32xf32, #tpu.memory_space<vmem>>, vector<1x32xf32>
    %24 = vector.broadcast %23 : vector<1x32xf32> to vector<16x32xf32>
    %25 = arith.mulf %22, %24 : vector<16x32xf32>
    %c0_10 = arith.constant 0 : index
    %c0_11 = arith.constant 0 : index
    %26 = vector.load %arg5[%c0_10, %c0_11] : memref<1x32xf32, #tpu.memory_space<vmem>>, vector<1x32xf32>
    %27 = vector.broadcast %26 : vector<1x32xf32> to vector<16x32xf32>
    %28 = arith.addf %25, %27 : vector<16x32xf32>
    %c0_12 = arith.constant 0 : index
    %c0_13 = arith.constant 0 : index
    %29 = vector.load %arg6[%c0_12, %c0_13] : memref<16x32xf32, #tpu.memory_space<vmem>>, vector<16x32xf32>
    tpu.vector_store %arg6[%c0_12, %c0_13], %28 {strides = array<i32>} : memref<16x32xf32, #tpu.memory_space<vmem>>, vector<16x32xf32>,
    return
  }
  func.func @transform_0(%arg0: i32, %arg1: memref<1xi32, #tpu.memory_space<smem>>) -> (i32, i32) {
    %c0_i32 = arith.constant 0 : i32
    %c0_i32_0 = arith.constant 0 : i32
    return %arg0, %c0_i32 : i32, i32
  }
  func.func @transform_1(%arg0: i32, %arg1: memref<1xi32, #tpu.memory_space<smem>>) -> (i32, i32) {
    %c0_i32 = arith.constant 0 : i32
    %c0_i32_0 = arith.constant 0 : i32
    return %arg0, %c0_i32 : i32, i32
  }
  func.func @transform_2(%arg0: i32, %arg1: memref<1xi32, #tpu.memory_space<smem>>) -> (i32, i32) {
    %c0_i32 = arith.constant 0 : i32
    %c0_i32_0 = arith.constant 0 : i32
    %c0_i32_1 = arith.constant 0 : i32
    return %c0_i32, %c0_i32_0 : i32, i32
  }
  func.func @transform_3(%arg0: i32, %arg1: memref<1xi32, #tpu.memory_space<smem>>) -> (i32, i32) {
    %c0_i32 = arith.constant 0 : i32
    %c0_i32_0 = arith.constant 0 : i32
    %c0_i32_1 = arith.constant 0 : i32
    return %c0_i32, %c0_i32_0 : i32, i32
  }
  func.func @transform_4(%arg0: i32, %arg1: memref<1xi32, #tpu.memory_space<smem>>) -> (i32, i32) {
    %c0_i32 = arith.constant 0 : i32
    %c0_i32_0 = arith.constant 0 : i32
    return %arg0, %c0_i32 : i32, i32
  }
}

</mosaic_0001>

<bundles_post_ra>
// kernel: tpu_custom_call.1
= control target key start
LH: loop header
LB: loop body
LE: loop exit
PB: predicated region body
PF: predicated region fallthrough
CT: control target
= control target key end

     0   :  { %11 = vsyncpa [#allocation5], 0  ;;  %s301_s0 = inlined_call_operand.<no memory space> [shape: s32[1], index: 0, kind: input, shape index: {}]   ;;  %s302_s1 = inlined_call_operand.hbm [shape: f32[16,32], index: 1, kind: input, shape index: {}]   ;;  %s303_s2 = inlined_call_operand.hbm [shape: f32[16,32], index: 2, kind: input, shape index: {}]   ;;  %s304_s3 = inlined_call_operand.vmem [shape: f32[1,32], index: 3, kind: input, shape index: {}]   ;;  %s305_s4 = inlined_call_operand.vmem [shape: f32[1,32], index: 4, kind: input, shape index: {}]   ;;  %s306_s5 = inlined_call_operand.hbm [shape: f32[16,32], index: 5, kind: output, shape index: {}]  }
   0x1   :  { %12 = vsyncpa [#allocation8], 0 }
   0x2   :  { %13 = vsyncpa [#allocation6], 0  ;;  %s209_s18 = smov [#allocation4]   ;;  %s137_s21 = scalar_lea.hbm %s302_s1, 256 }
   0x3   :  { %s19_s0 = sshll.u32 %s209_s18, 4  ;;  %p138_p0 = scmp.ne.s32.totalorder %s302_s1, %s137_s21  ;;  %s20_s0 = int_to_ptr.vmem [resolvable:$true] %s19_s0 }
   0x4   :  { %p141_p1 = scmp.lt.u32.totalorder %s137_s21, %s302_s1 }
   0x6   :  { %p143_p2 = pnand %p141_p1, %p138_p0 }
   0x8   :  { %146 = shalt.err (!%p143_p2)
}
   0x9   :  { %s147_s26 = scalar_lea.vmem %s20_s0, 256  ;;  %p152_p4 = scmp.lt.s32.totalorder %s20_s0, %s20_s0 }
   0xa   :  { %p148_p3 = scmp.ne.s32.totalorder %s20_s0, %s147_s26  ;;  %p153_p5 = scmp.lt.s32.totalorder %s147_s26, %s147_s26 }
   0xc   :  { %p154_p6 = por %p153_p5, %p152_p4 }
   0xe   :  { %p155_p7 = pnand %p154_p6, %p148_p3 }
  0x10   :  { %158 = shalt.err (!%p155_p7)
}
  0x11   :  { %s210_s27 = smov 128   ;;  %s211_s28 = smov 8  }
  0x12   :  { %25 = dma.hbm_to_vmem [thread:$0]  %s302_s1, 256, %s20_s0, [#allocation5], %s210_s27, %s210_s27, %s211_s28  }
  0x13   :  { %s212_s6 = smov [#allocation7]   ;;  %s159_s10 = scalar_lea.hbm %s303_s2, 256 }
  0x14   :  { %s31_s7 = sshll.u32 %s212_s6, 4  ;;  %p160_p8 = scmp.ne.s32.totalorder %s303_s2, %s159_s10  ;;  %s32_s7 = int_to_ptr.vmem [resolvable:$true] %s31_s7 }
  0x15   :  { %p163_p9 = scmp.lt.u32.totalorder %s159_s10, %s303_s2 }
  0x17   :  { %p165_p10 = pnand %p163_p9, %p160_p8 }
  0x19   :  { %168 = shalt.err (!%p165_p10)
}
  0x1a   :  { %s169_s15 = scalar_lea.vmem %s32_s7, 256  ;;  %p174_p12 = scmp.lt.s32.totalorder %s32_s7, %s32_s7 }
  0x1b   :  { %p170_p11 = scmp.ne.s32.totalorder %s32_s7, %s169_s15  ;;  %p175_p13 = scmp.lt.s32.totalorder %s169_s15, %s169_s15 }
  0x1d   :  { %p176_p0 = por %p175_p13, %p174_p12 }
  0x1f   :  { %p177_p1 = pnand %p176_p0, %p170_p11 }
  0x21   :  { %180 = shalt.err (!%p177_p1)
}
  0x22   :  { %37 = dma.hbm_to_vmem [thread:$0]  %s303_s2, 256, %s32_s7, [#allocation8], %s210_s27, %s210_s27, %s211_s28  }
  0x23   :  { %203 = dma.done.wait [#allocation5], 256  }
  0x24   :  { %204 = vsyncadd [#allocation5], 4294967040 }
  0x25   :  { %205 = dma.done.wait [#allocation8], 256  }
  0x26   :  { %206 = vsyncadd [#allocation8], 4294967040  ;;  %v48_v0 = vld [vmem:[#allocation4] sm:$0xff]  ;;  %v50_v1 = vld [vmem:[#allocation7] sm:$0xff]  ;;  %vm54_vm0 = vcmask 261120   ;;  %s213_s19 = smov [#allocation9]  }
  0x27   :  { %v49_v2 = vld [vmem:[#allocation4 + $0x8] sm:$0xff]  ;;  %v52_v3 = vadd.f32 %v50_v1, %v48_v0  ;;  %v51_v4 = vld [vmem:[#allocation7 + $0x8] sm:$0xff]  ;;  %v126_v30 = vld [vmem:[%s304_s3] ss:$0 sm:$0xff]  ;;  %s113_s20 = sshll.u32 %s213_s19, 4  ;;  %s114_s20 = int_to_ptr.vmem [resolvable:$true] %s113_s20 }
  0x28   :  { %v53_v5 = vadd.f32 %v51_v4, %v49_v2  ;;  %v127_v32 = vld [vmem:[%s305_s4] ss:$0 sm:$0xff]  ;;  %s181_s3 = scalar_lea.vmem %s114_s20, 256  ;;  %p186_p3 = scmp.lt.s32.totalorder %s114_s20, %s114_s20 }
  0x29   :  { %v55_v6 = vsel %vm54_vm0, %v52_v3, 0.0  ;;  %v64_v7 = vmul.f32 %v52_v3, %v52_v3  ;;  %p182_p2 = scmp.ne.s32.totalorder %s114_s20, %s181_s3  ;;  %p187_p4 = scmp.lt.s32.totalorder %s181_s3, %s181_s3 }
  0x2a   :  { %56 = vadd.xlane.f32.xlu0 %v55_v6  ;;  %v65_v8 = vmul.f32 %v53_v5, %v53_v5  ;;  %v58_v10 = vsel %vm54_vm0, %v53_v5, 0.0 }
  0x2b   :  { %v66_v9 = vsel %vm54_vm0, %v64_v7, 0.0  ;;  %p188_p5 = por %p187_p4, %p186_p3 }
  0x2c   :  { %67 = vadd.xlane.f32.xlu1 %v66_v9  ;;  %v69_v11 = vsel %vm54_vm0, %v65_v8, 0.0 }
  0x2d   :  { %p189_p6 = pnand %p188_p5, %p182_p2 }
  0x2e   :  { %59 = vadd.xlane.f32.xlu0 %v58_v10 }
  0x30   :  { %70 = vadd.xlane.f32.xlu1 %v69_v11 }
  0xb7   :  { %v57_v12 = vpop.xlane.xlu0 %56 }
  0xb8   :  { %v62_v13 = vmul.f32 0.03125, %v57_v12 }
  0xb9   :  { %v68_v14 = vpop.xlane.xlu1 %67 }
  0xba   :  { %v74_v15 = vmul.f32 %v62_v13, %v62_v13  ;;  %v72_v16 = vmul.f32 0.03125, %v68_v14  ;;  %v80_v28 = vsub.f32 %v52_v3, %v62_v13 }
  0xbb   :  { %v60_v17 = vpop.xlane.xlu0 %59 }
  0xbc   :  { %v76_v18 = vsub.f32 %v72_v16, %v74_v15  ;;  %v63_v19 = vmul.f32 0.03125, %v60_v17 }
  0xbd   :  { %v71_v20 = vpop.xlane.xlu1 %70 }
  0xbe   :  { %v78_v21 = vmax.f32 %v76_v18, 0.0  ;;  %v75_v22 = vmul.f32 %v63_v19, %v63_v19  ;;  %v73_v23 = vmul.f32 0.03125, %v71_v20  ;;  %v81_v33 = vsub.f32 %v53_v5, %v63_v19 }
  0xc0   :  { %v82_v24 = vadd.f32 1e-05, %v78_v21  ;;  %v77_v25 = vsub.f32 %v73_v23, %v75_v22 }
  0xc2   :  { %133 = vrsqrt.f32 %v82_v24  ;;  %v79_v26 = vmax.f32 %v77_v25, 0.0 }
  0xc4   :  { %v83_v27 = vadd.f32 1e-05, %v79_v26 }
  0xc6   :  { %135 = vrsqrt.f32 %v83_v27 }
  0xcc   :  { %v134_v29 = vpop.eup %133 }
  0xcd   :  { %v86_v31 = vmul.f32 %v134_v29, %v80_v28 }
  0xcf   :  { %v95_v34 = vmul.f32 %v126_v30, %v86_v31 }
  0xd0   :  { %v136_v35 = vpop.eup %135 }
  0xd1   :  { %v87_v36 = vmul.f32 %v136_v35, %v81_v33  ;;  %v104_v37 = vadd.f32 %v127_v32, %v95_v34 }
  0xd3   :  { %v96_v38 = vmul.f32 %v126_v30, %v87_v36  ;;  %106 = vst.msk [vmem:[#allocation9] sm:$0xff] %vm54_vm0, %v104_v37 }
  0xd5   :  { %v105_v39 = vadd.f32 %v127_v32, %v96_v38 }
  0xd7   :  { %107 = vst.msk [vmem:[#allocation9 + $0x8] sm:$0xff] %vm54_vm0, %v105_v39 }
  0xd8   :  { %192 = shalt.err (!%p189_p6)
}
  0xd9   :  { %s193_s22 = scalar_lea.hbm %s306_s5, 256 }
  0xda   :  { %p194_p7 = scmp.ne.s32.totalorder %s306_s5, %s193_s22  ;;  %p197_p8 = scmp.lt.u32.totalorder %s193_s22, %s306_s5 }
  0xdc   :  { %p199_p9 = pnand %p197_p8, %p194_p7 }
  0xde   :  { %202 = shalt.err (!%p199_p9)
}
  0xdf   :  { %119 = dma.vmem_to_hbm [thread:$0]  %s114_s20, 256, %s306_s5, [#allocation6], %s210_s27, %s210_s27, %s211_s28  }
  0xe0   :  { %207 = dma.done.wait [#allocation6], 256  }
  0xe1   :  { %208 = vsyncadd [#allocation6], 4294967040 }
  0xe2   :  { %123 = vsyncpa [#allocation5], 1 }
  0xe3   :  { %124 = vsyncpa [#allocation8], 1 }
  0xe4   :  { %125 = vsyncpa [#allocation6], 1 }

</bundles_post_ra>
